<compile_context>
chip_gen: v5e
topology: v5e:2x2
jax: 0.10.0
libtpu: 0.0.40
codegen_flags: <defaults>
</compile_context>

<pallas_src>
import jax
import jax.numpy as jnp
from jax.experimental import pallas as pl
from jax.experimental.pallas import tpu as pltpu


def _recommender_kernel(
    text_ref, ctx_ref,
    convT_w_ref, conv_b_ref,
    w_ctx_ref, b_ctx_ref,
    fc1w_text_ref, fc1w_ctx_ref, fc1_b_ref,
    fc2_w_ref, fc2_b_ref,
    out_w_ref, out_b_ref,
    out_ref,
):
    f32 = jnp.float32
    bf16 = jnp.bfloat16

    # --- text branch: Conv1d as ONE Toeplitz matmul (full 128-wide contraction)
    x = text_ref[...]                                          # (TB, S*E) bf16
    conv = jnp.dot(x, convT_w_ref[...], preferred_element_type=f32)  # (TB, L*F)
    F = conv_b_ref.shape[1]
    L = conv.shape[1] // F

    # running elementwise max over the L lane-groups (no reshape / xlane reduce)
    m = conv[:, :F]
    for l in range(1, L):                                       # L small, static
        m = jnp.maximum(m, conv[:, l * F:(l + 1) * F])
    # bias is constant over time and ReLU is monotone -> apply after the max
    x_text = jnp.maximum(m + conv_b_ref[...], 0.0)              # (TB, F) f32

    # --- contextual branches: one fused block-diagonal dense + ReLU
    h_ctx = jnp.dot(ctx_ref[...], w_ctx_ref[...], preferred_element_type=f32)
    h_ctx = jnp.maximum(h_ctx + b_ctx_ref[...], 0.0)            # (TB, 4*DU) f32

    # --- fc1 on the "combined" features without materializing the concat:
    #     fc1 weight split by rows, partial matmuls summed.
    h1 = (jnp.dot(x_text.astype(bf16), fc1w_text_ref[...],
                  preferred_element_type=f32)
          + jnp.dot(h_ctx.astype(bf16), fc1w_ctx_ref[...],
                    preferred_element_type=f32)
          + fc1_b_ref[...])
    h1 = jnp.maximum(h1, 0.0)                                   # (TB, H1) f32
    # TODO(synk): dropout1/dropout2 are identity (eval mode only).

    h2 = jnp.maximum(
        jnp.dot(h1.astype(bf16), fc2_w_ref[...], preferred_element_type=f32)
        + fc2_b_ref[...], 0.0)                                  # (TB, H2) f32

    # --- output projection, written lane-dense as (1, TB):
    #     (1, H2) x (TB, H2)^T -> (1, TB)    (NT matmul, no explicit transpose)
    y = jax.lax.dot_general(out_w_ref[...], h2,
                            (((1,), (1,)), ((), ())),
                            preferred_element_type=f32)         # (1, TB)
    out_ref[...] = y + out_b_ref[...]


def _toeplitz_conv_weight(conv_w, S):
    """Build the block-banded (S*E, L*F) weight for 'valid' Conv1d as matmul."""
    K, E, F = conv_w.shape
    L = S - K + 1
    W = jnp.zeros((S, E, L, F), dtype=conv_w.dtype)
    for l in range(L):                                          # L small, static
        W = W.at[l:l + K, :, l, :].set(conv_w)
    return W.reshape(S * E, L * F)


def recommender_forward(params, text, location, item_season, category,
                        query_season, *, max_batch_tile=2048):
    B, S = text.shape
    K, E, F = params["conv_w"].shape
    assert S >= K, "sequence length must be >= conv kernel_size"
    assert max_batch_tile % 128 == 0

    # Wrapper-side glue: embedding gathers (bf16, no f32 intermediate),
    # flatten text to a lane-dense (B, S*E), contextual concat.
    text_flat = jnp.take(params["emb_text"], text, axis=0).reshape(B, S * E)
    cat_emb = jnp.take(params["emb_cat"], category, axis=0)
    ctx = jnp.concatenate(
        [location, item_season, cat_emb, query_season], axis=1
    ).astype(jnp.bfloat16)                                      # (B, Dctx)
    Dctx = ctx.shape[1]

    convT_w = _toeplitz_conv_weight(params["conv_w"], S)        # (S*E, L*F) bf16

    # Batch tiling: pad only to a multiple of 128; tiles are 128-aligned and
    # roughly balanced, so waste is bounded by ~128*n_tiles rows.
    M = pl.cdiv(B, 128)                     # number of 128-row blocks
    blocks_per_tile = max(1, max_batch_tile // 128)
    n_tiles = pl.cdiv(M, blocks_per_tile)   # >= 2 programs once B > max tile
    TB = 128 * pl.cdiv(M, n_tiles)
    Bp = TB * n_tiles
    if Bp != B:
        text_flat = jnp.pad(text_flat, ((0, Bp - B), (0, 0)))
        ctx = jnp.pad(ctx, ((0, Bp - B), (0, 0)))
    grid = (n_tiles,)

    weights = (
        convT_w, params["conv_b"],
        params["w_ctx"], params["b_ctx"],
        params["fc1_w_text"], params["fc1_w_ctx"], params["fc1_b"],
        params["fc2_w"], params["fc2_b"],
        params["out_w"], params["out_b"],
    )

    def batch_spec(cols):
        return pl.BlockSpec((TB, cols), lambda i: (i, 0))

    def const_spec(arr):
        zeros = (0,) * arr.ndim
        return pl.BlockSpec(arr.shape, lambda i, zeros=zeros: zeros)

    in_specs = ([batch_spec(S * E), batch_spec(Dctx)]
                + [const_spec(w) for w in weights])
    out_specs = pl.BlockSpec((1, TB), lambda i: (0, i))

    # Advisory cost estimate so XLA schedules this call against the gathers.
    DU4 = params["w_ctx"].shape[1]
    H1 = params["fc1_b"].shape[1]
    H2 = params["fc2_b"].shape[1]
    L = S - K + 1
    flops = 2 * Bp * (S * E * L * F + Dctx * DU4 + (F + DU4) * H1 + H1 * H2 + H2)
    bytes_accessed = (text_flat.size * text_flat.dtype.itemsize
                      + ctx.size * ctx.dtype.itemsize
                      + sum(int(w.size) * w.dtype.itemsize for w in weights)
                      + Bp * 4)
    cost = pl.CostEstimate(flops=int(flops), transcendentals=0,
                           bytes_accessed=int(bytes_accessed))

    out = pl.pallas_call(
        _recommender_kernel,
        out_shape=jax.ShapeDtypeStruct((1, Bp), jnp.float32),
        grid=grid,
        in_specs=in_specs,
        out_specs=out_specs,
        compiler_params=pltpu.CompilerParams(
            dimension_semantics=("parallel",),
            vmem_limit_bytes=32 * 1024 * 1024),   # safe ceiling for v7x 64 MiB
        cost_estimate=cost,
    )(text_flat, ctx, *weights)

    return out[0, :B][:, None]                                  # (B, 1) f32


def init_params(key, *, vocab_size, text_embedding_dim, location_input_dim,
                item_season_input_dim, query_season_input_dim, num_categories,
                category_embedding_dim, conv_filters, kernel_size, dense_units,
                shared_dense_units):
    ks = jax.random.split(key, 24)
    s = 0.1
    f32, bf16 = jnp.float32, jnp.bfloat16

    def nrm(k, shape, dtype=f32):
        return (s * jax.random.normal(k, shape, dtype=f32)).astype(dtype)

    emb_text = nrm(ks[0], (vocab_size, text_embedding_dim), bf16)
    emb_text = emb_text.at[0].set(0.0)          # padding_idx=0 -> zero row
    emb_cat = nrm(ks[1], (num_categories, category_embedding_dim))

    # Conv1d weight stored as (K, E, F) (PyTorch layout is (F, E, K)).
    conv_w = nrm(ks[2], (kernel_size, text_embedding_dim, conv_filters), bf16)
    conv_b = nrm(ks[3], (1, conv_filters))

    # Four contextual branches fused into one block-diagonal weight
    # (order: location, item_season, category, query_season — matches the
    # PyTorch `combined` concat order after the text block).
    du = dense_units
    branch_dims = (location_input_dim, item_season_input_dim,
                   category_embedding_dim, query_season_input_dim)
    d_ctx = sum(branch_dims)
    w_ctx = jnp.zeros((d_ctx, 4 * du), dtype=f32)
    r = 0
    for bi, d in enumerate(branch_dims):
        w_ctx = w_ctx.at[r:r + d, bi * du:(bi + 1) * du].set(
            s * jax.random.normal(ks[4 + bi], (d, du), dtype=f32))
        r += d
    b_ctx = jnp.concatenate([nrm(ks[8 + bi], (1, du)) for bi in range(4)],
                            axis=1)

    h1 = shared_dense_units
    h2 = shared_dense_units // 2
    return {
        "emb_text": emb_text,
        "emb_cat": emb_cat,
        "conv_w": conv_w,
        "conv_b": conv_b,
        "w_ctx": w_ctx.astype(bf16),
        "b_ctx": b_ctx,
        # fc1 weight split by rows: text block (F rows), contextual block.
        "fc1_w_text": nrm(ks[12], (conv_filters, h1), bf16),
        "fc1_w_ctx": nrm(ks[13], (4 * du, h1), bf16),
        "fc1_b": nrm(ks[14], (1, h1)),
        "fc2_w": nrm(ks[15], (h1, h2), bf16),
        "fc2_b": nrm(ks[16], (1, h2)),
        "out_w": nrm(ks[17], (1, h2)),          # row vector -> lane-dense output
        "out_b": nrm(ks[18], (1, 1)),
    }


if __name__ == "__main__":
    # Small hyperparameters consistent with the module's __init__.
    cfg = dict(
        vocab_size=50,
        text_embedding_dim=16,
        location_input_dim=4,
        item_season_input_dim=4,
        query_season_input_dim=4,
        num_categories=10,
        category_embedding_dim=8,
        conv_filters=16,
        kernel_size=3,
        dense_units=8,
        shared_dense_units=32,
    )
    B, S = 2, 8

    key = jax.random.PRNGKey(0)
    kp, k1, k2, k3, k4, k5 = jax.random.split(key, 6)
    params = init_params(kp, **cfg)

    text = jax.random.randint(k1, (B, S), 0, cfg["vocab_size"], dtype=jnp.int32)
    location = jax.random.normal(k2, (B, cfg["location_input_dim"]),
                                 dtype=jnp.float32)
    item_season = jax.random.normal(k3, (B, cfg["item_season_input_dim"]),
                                    dtype=jnp.float32)
    category = jax.random.randint(k4, (B,), 0, cfg["num_categories"],
                                  dtype=jnp.int32)
    query_season = jax.random.normal(k5, (B, cfg["query_season_input_dim"]),
                                     dtype=jnp.float32)

    out = recommender_forward(params, text, location, item_season, category,
                              query_season)
    out = jax.block_until_ready(out)
    assert out.shape == (B, 1) and out.dtype == jnp.float32
    assert bool(jnp.all(jnp.isfinite(out)))
    print("KERNEL_OK")
</pallas_src>

<mosaic_0001>
module attributes {stable_mosaic.version = 11 : i64} {
  func.func @_recommender_kernel(%arg0: i32, %arg1: memref<128x128xbf16, #tpu.memory_space<vmem>>, %arg2: memref<128x20xbf16, #tpu.memory_space<vmem>>, %arg3: memref<128x96xbf16, #tpu.memory_space<vmem>>, %arg4: memref<1x16xf32, #tpu.memory_space<vmem>>, %arg5: memref<20x32xbf16, #tpu.memory_space<vmem>>, %arg6: memref<1x32xf32, #tpu.memory_space<vmem>>, %arg7: memref<16x32xbf16, #tpu.memory_space<vmem>>, %arg8: memref<32x32xbf16, #tpu.memory_space<vmem>>, %arg9: memref<1x32xf32, #tpu.memory_space<vmem>>, %arg10: memref<32x16xbf16, #tpu.memory_space<vmem>>, %arg11: memref<1x16xf32, #tpu.memory_space<vmem>>, %arg12: memref<1x16xf32, #tpu.memory_space<vmem>>, %arg13: memref<1x1xf32, #tpu.memory_space<vmem>>, %arg14: memref<1x128xf32, #tpu.memory_space<vmem>>) attributes {dimension_semantics = [#tpu.dimension_semantics<parallel>], iteration_bounds = array<i64: 1>, scalar_prefetch = 0 : i64, scratch_operands = 0 : i64, tpu.core_type = #tpu.core_type<tc>, window_params = [{transform_indices = @transform_0, window_bounds = array<i64: 128, 128>}, {transform_indices = @transform_1, window_bounds = array<i64: 128, 20>}, {pipeline_mode = #tpu.pipeline_mode<synchronous>, transform_indices = @transform_2, window_bounds = array<i64: 128, 96>}, {pipeline_mode = #tpu.pipeline_mode<synchronous>, transform_indices = @transform_3, window_bounds = array<i64: 1, 16>}, {pipeline_mode = #tpu.pipeline_mode<synchronous>, transform_indices = @transform_4, window_bounds = array<i64: 20, 32>}, {pipeline_mode = #tpu.pipeline_mode<synchronous>, transform_indices = @transform_5, window_bounds = array<i64: 1, 32>}, {pipeline_mode = #tpu.pipeline_mode<synchronous>, transform_indices = @transform_6, window_bounds = array<i64: 16, 32>}, {pipeline_mode = #tpu.pipeline_mode<synchronous>, transform_indices = @transform_7, window_bounds = array<i64: 32, 32>}, {pipeline_mode = #tpu.pipeline_mode<synchronous>, transform_indices = @transform_8, window_bounds = array<i64: 1, 32>}, {pipeline_mode = #tpu.pipeline_mode<synchronous>, transform_indices = @transform_9, window_bounds = array<i64: 32, 16>}, {pipeline_mode = #tpu.pipeline_mode<synchronous>, transform_indices = @transform_10, window_bounds = array<i64: 1, 16>}, {pipeline_mode = #tpu.pipeline_mode<synchronous>, transform_indices = @transform_11, window_bounds = array<i64: 1, 16>}, {pipeline_mode = #tpu.pipeline_mode<synchronous>, transform_indices = @transform_12, window_bounds = array<i64: 1, 1>}, {transform_indices = @transform_13, window_bounds = array<i64: 1, 128>}]} {
    %c0 = arith.constant 0 : index
    %c0_0 = arith.constant 0 : index
    %0 = vector.load %arg1[%c0, %c0_0] : memref<128x128xbf16, #tpu.memory_space<vmem>>, vector<128x128xbf16>
    %c0_1 = arith.constant 0 : index
    %c0_2 = arith.constant 0 : index
    %1 = vector.load %arg3[%c0_1, %c0_2] : memref<128x96xbf16, #tpu.memory_space<vmem>>, vector<128x96xbf16>
    %cst = arith.constant dense<0.000000e+00> : vector<128x96xf32>
    %2 = tpu.matmul %0, %1, %cst {dimension_numbers = #tpu.dot_dimension_numbers<[1], [0], [0], [1], [0, 0, 1, 1], [], []>} : vector<128x128xbf16>, vector<128x96xbf16>, vector<128x96xf32> -> vector<128x96xf32>
    %3 = vector.extract_strided_slice %2 {offsets = [0, 0], sizes = [128, 16], strides = [1, 1]} : vector<128x96xf32> to vector<128x16xf32>
    %4 = vector.extract_strided_slice %2 {offsets = [0, 16], sizes = [128, 16], strides = [1, 1]} : vector<128x96xf32> to vector<128x16xf32>
    %5 = arith.maximumf %3, %4 : vector<128x16xf32>
    %6 = vector.extract_strided_slice %2 {offsets = [0, 32], sizes = [128, 16], strides = [1, 1]} : vector<128x96xf32> to vector<128x16xf32>
    %7 = arith.maximumf %5, %6 : vector<128x16xf32>
    %8 = vector.extract_strided_slice %2 {offsets = [0, 48], sizes = [128, 16], strides = [1, 1]} : vector<128x96xf32> to vector<128x16xf32>
    %9 = arith.maximumf %7, %8 : vector<128x16xf32>
    %10 = vector.extract_strided_slice %2 {offsets = [0, 64], sizes = [128, 16], strides = [1, 1]} : vector<128x96xf32> to vector<128x16xf32>
    %11 = arith.maximumf %9, %10 : vector<128x16xf32>
    %12 = vector.extract_strided_slice %2 {offsets = [0, 80], sizes = [128, 16], strides = [1, 1]} : vector<128x96xf32> to vector<128x16xf32>
    %13 = arith.maximumf %11, %12 : vector<128x16xf32>
    %c0_3 = arith.constant 0 : index
    %c0_4 = arith.constant 0 : index
    %14 = vector.load %arg4[%c0_3, %c0_4] : memref<1x16xf32, #tpu.memory_space<vmem>>, vector<1x16xf32>
    %15 = vector.broadcast %14 : vector<1x16xf32> to vector<128x16xf32>
    %16 = arith.addf %13, %15 : vector<128x16xf32>
    %cst_5 = arith.constant 0.000000e+00 : f32
    %17 = vector.broadcast %cst_5 : f32 to vector<128x16xf32>
    %18 = arith.maximumf %16, %17 : vector<128x16xf32>
    %c0_6 = arith.constant 0 : index
    %c0_7 = arith.constant 0 : index
    %19 = vector.load %arg2[%c0_6, %c0_7] : memref<128x20xbf16, #tpu.memory_space<vmem>>, vector<128x20xbf16>
    %c0_8 = arith.constant 0 : index
    %c0_9 = arith.constant 0 : index
    %20 = vector.load %arg5[%c0_8, %c0_9] : memref<20x32xbf16, #tpu.memory_space<vmem>>, vector<20x32xbf16>
    %cst_10 = arith.constant dense<0.000000e+00> : vector<128x32xf32>
    %21 = tpu.matmul %19, %20, %cst_10 {dimension_numbers = #tpu.dot_dimension_numbers<[1], [0], [0], [1], [0, 0, 1, 1], [], []>} : vector<128x20xbf16>, vector<20x32xbf16>, vector<128x32xf32> -> vector<128x32xf32>
    %c0_11 = arith.constant 0 : index
    %c0_12 = arith.constant 0 : index
    %22 = vector.load %arg6[%c0_11, %c0_12] : memref<1x32xf32, #tpu.memory_space<vmem>>, vector<1x32xf32>
    %23 = vector.broadcast %22 : vector<1x32xf32> to vector<128x32xf32>
    %24 = arith.addf %21, %23 : vector<128x32xf32>
    %cst_13 = arith.constant 0.000000e+00 : f32
    %25 = vector.broadcast %cst_13 : f32 to vector<128x32xf32>
    %26 = arith.maximumf %24, %25 : vector<128x32xf32>
    %27 = arith.truncf %18 : vector<128x16xf32> to vector<128x16xbf16>
    %c0_14 = arith.constant 0 : index
    %c0_15 = arith.constant 0 : index
    %28 = vector.load %arg7[%c0_14, %c0_15] : memref<16x32xbf16, #tpu.memory_space<vmem>>, vector<16x32xbf16>
    %cst_16 = arith.constant dense<0.000000e+00> : vector<128x32xf32>
    %29 = tpu.matmul %27, %28, %cst_16 {dimension_numbers = #tpu.dot_dimension_numbers<[1], [0], [0], [1], [0, 0, 1, 1], [], []>} : vector<128x16xbf16>, vector<16x32xbf16>, vector<128x32xf32> -> vector<128x32xf32>
    %30 = arith.truncf %26 : vector<128x32xf32> to vector<128x32xbf16>
    %c0_17 = arith.constant 0 : index
    %c0_18 = arith.constant 0 : index
    %31 = vector.load %arg8[%c0_17, %c0_18] : memref<32x32xbf16, #tpu.memory_space<vmem>>, vector<32x32xbf16>
    %cst_19 = arith.constant dense<0.000000e+00> : vector<128x32xf32>
    %32 = tpu.matmul %30, %31, %cst_19 {dimension_numbers = #tpu.dot_dimension_numbers<[1], [0], [0], [1], [0, 0, 1, 1], [], []>} : vector<128x32xbf16>, vector<32x32xbf16>, vector<128x32xf32> -> vector<128x32xf32>
    %33 = arith.addf %29, %32 : vector<128x32xf32>
    %c0_20 = arith.constant 0 : index
    %c0_21 = arith.constant 0 : index
    %34 = vector.load %arg9[%c0_20, %c0_21] : memref<1x32xf32, #tpu.memory_space<vmem>>, vector<1x32xf32>
    %35 = vector.broadcast %34 : vector<1x32xf32> to vector<128x32xf32>
    %36 = arith.addf %33, %35 : vector<128x32xf32>
    %cst_22 = arith.constant 0.000000e+00 : f32
    %37 = vector.broadcast %cst_22 : f32 to vector<128x32xf32>
    %38 = arith.maximumf %36, %37 : vector<128x32xf32>
    %39 = arith.truncf %38 : vector<128x32xf32> to vector<128x32xbf16>
    %c0_23 = arith.constant 0 : index
    %c0_24 = arith.constant 0 : index
    %40 = vector.load %arg10[%c0_23, %c0_24] : memref<32x16xbf16, #tpu.memory_space<vmem>>, vector<32x16xbf16>
    %cst_25 = arith.constant dense<0.000000e+00> : vector<128x16xf32>
    %41 = tpu.matmul %39, %40, %cst_25 {dimension_numbers = #tpu.dot_dimension_numbers<[1], [0], [0], [1], [0, 0, 1, 1], [], []>} : vector<128x32xbf16>, vector<32x16xbf16>, vector<128x16xf32> -> vector<128x16xf32>
    %c0_26 = arith.constant 0 : index
    %c0_27 = arith.constant 0 : index
    %42 = vector.load %arg11[%c0_26, %c0_27] : memref<1x16xf32, #tpu.memory_space<vmem>>, vector<1x16xf32>
    %43 = vector.broadcast %42 : vector<1x16xf32> to vector<128x16xf32>
    %44 = arith.addf %41, %43 : vector<128x16xf32>
    %cst_28 = arith.constant 0.000000e+00 : f32
    %45 = vector.broadcast %cst_28 : f32 to vector<128x16xf32>
    %46 = arith.maximumf %44, %45 : vector<128x16xf32>
    %c0_29 = arith.constant 0 : index
    %c0_30 = arith.constant 0 : index
    %47 = vector.load %arg12[%c0_29, %c0_30] : memref<1x16xf32, #tpu.memory_space<vmem>>, vector<1x16xf32>
    %cst_31 = arith.constant dense<0.000000e+00> : vector<1x128xf32>
    %48 = tpu.matmul %47, %46, %cst_31 {dimension_numbers = #tpu.dot_dimension_numbers<[1], [1], [0], [0], [0, 0, 1, 0], [], []>} : vector<1x16xf32>, vector<128x16xf32>, vector<1x128xf32> -> vector<1x128xf32>
    %c0_32 = arith.constant 0 : index
    %c0_33 = arith.constant 0 : index
    %49 = vector.load %arg13[%c0_32, %c0_33] : memref<1x1xf32, #tpu.memory_space<vmem>>, vector<1x1xf32>
    %50 = vector.broadcast %49 : vector<1x1xf32> to vector<1x128xf32>
    %51 = arith.addf %48, %50 : vector<1x128xf32>
    %c0_34 = arith.constant 0 : index
    %c0_35 = arith.constant 0 : index
    %52 = vector.load %arg14[%c0_34, %c0_35] : memref<1x128xf32, #tpu.memory_space<vmem>>, vector<1x128xf32>
    tpu.vector_store %arg14[%c0_34, %c0_35], %51 {strides = array<i32>} : memref<1x128xf32, #tpu.memory_space<vmem>>, vector<1x128xf32>,
    return
  }
  func.func @transform_0(%arg0: i32) -> (i32, i32) {
    %c0_i32 = arith.constant 0 : i32
    %c0_i32_0 = arith.constant 0 : i32
    return %arg0, %c0_i32 : i32, i32
  }
  func.func @transform_1(%arg0: i32) -> (i32, i32) {
    %c0_i32 = arith.constant 0 : i32
    %c0_i32_0 = arith.constant 0 : i32
    return %arg0, %c0_i32 : i32, i32
  }
  func.func @transform_2(%arg0: i32) -> (i32, i32) {
    %c0_i32 = arith.constant 0 : i32
    %c0_i32_0 = arith.constant 0 : i32
    %c0_i32_1 = arith.constant 0 : i32
    return %c0_i32, %c0_i32_0 : i32, i32
  }
  func.func @transform_3(%arg0: i32) -> (i32, i32) {
    %c0_i32 = arith.constant 0 : i32
    %c0_i32_0 = arith.constant 0 : i32
    %c0_i32_1 = arith.constant 0 : i32
    return %c0_i32, %c0_i32_0 : i32, i32
  }
  func.func @transform_4(%arg0: i32) -> (i32, i32) {
    %c0_i32 = arith.constant 0 : i32
    %c0_i32_0 = arith.constant 0 : i32
    %c0_i32_1 = arith.constant 0 : i32
    return %c0_i32, %c0_i32_0 : i32, i32
  }
  func.func @transform_5(%arg0: i32) -> (i32, i32) {
    %c0_i32 = arith.constant 0 : i32
    %c0_i32_0 = arith.constant 0 : i32
    %c0_i32_1 = arith.constant 0 : i32
    return %c0_i32, %c0_i32_0 : i32, i32
  }
  func.func @transform_6(%arg0: i32) -> (i32, i32) {
    %c0_i32 = arith.constant 0 : i32
    %c0_i32_0 = arith.constant 0 : i32
    %c0_i32_1 = arith.constant 0 : i32
    return %c0_i32, %c0_i32_0 : i32, i32
  }
  func.func @transform_7(%arg0: i32) -> (i32, i32) {
    %c0_i32 = arith.constant 0 : i32
    %c0_i32_0 = arith.constant 0 : i32
    %c0_i32_1 = arith.constant 0 : i32
    return %c0_i32, %c0_i32_0 : i32, i32
  }
  func.func @transform_8(%arg0: i32) -> (i32, i32) {
    %c0_i32 = arith.constant 0 : i32
    %c0_i32_0 = arith.constant 0 : i32
    %c0_i32_1 = arith.constant 0 : i32
    return %c0_i32, %c0_i32_0 : i32, i32
  }
  func.func @transform_9(%arg0: i32) -> (i32, i32) {
    %c0_i32 = arith.constant 0 : i32
    %c0_i32_0 = arith.constant 0 : i32
    %c0_i32_1 = arith.constant 0 : i32
    return %c0_i32, %c0_i32_0 : i32, i32
  }
  func.func @transform_10(%arg0: i32) -> (i32, i32) {
    %c0_i32 = arith.constant 0 : i32
    %c0_i32_0 = arith.constant 0 : i32
    %c0_i32_1 = arith.constant 0 : i32
    return %c0_i32, %c0_i32_0 : i32, i32
  }
  func.func @transform_11(%arg0: i32) -> (i32, i32) {
    %c0_i32 = arith.constant 0 : i32
    %c0_i32_0 = arith.constant 0 : i32
    %c0_i32_1 = arith.constant 0 : i32
    return %c0_i32, %c0_i32_0 : i32, i32
  }
  func.func @transform_12(%arg0: i32) -> (i32, i32) {
    %c0_i32 = arith.constant 0 : i32
    %c0_i32_0 = arith.constant 0 : i32
    %c0_i32_1 = arith.constant 0 : i32
    return %c0_i32, %c0_i32_0 : i32, i32
  }
  func.func @transform_13(%arg0: i32) -> (i32, i32) {
    %c0_i32 = arith.constant 0 : i32
    %c0_i32_0 = arith.constant 0 : i32
    return %c0_i32, %arg0 : i32, i32
  }
}

</mosaic_0001>

<bundles_post_ra>
// kernel: tpu_custom_call.1
= control target key start
LH: loop header
LB: loop body
LE: loop exit
PB: predicated region body
PF: predicated region fallthrough
CT: control target
= control target key end

     0   :  { %s1976_s0 = inlined_call_operand.vmem [shape: bf16[128,128], index: 0, kind: input, shape index: {}]   ;;  %s1977_s1 = inlined_call_operand.vmem [shape: bf16[128,20], index: 1, kind: input, shape index: {}]   ;;  %s1978_s2 = inlined_call_operand.vmem [shape: bf16[128,96], index: 2, kind: input, shape index: {}]   ;;  %s1979_s3 = inlined_call_operand.vmem [shape: f32[1,16], index: 3, kind: input, shape index: {}]   ;;  %s1980_s4 = inlined_call_operand.vmem [shape: bf16[20,32], index: 4, kind: input, shape index: {}]   ;;  %s1981_s5 = inlined_call_operand.vmem [shape: f32[1,32], index: 5, kind: input, shape index: {}]   ;;  %s1982_s6 = inlined_call_operand.vmem [shape: bf16[16,32], index: 6, kind: input, shape index: {}]   ;;  %s1983_s7 = inlined_call_operand.vmem [shape: bf16[32,32], index: 7, kind: input, shape index: {}]   ;;  %s1984_s8 = inlined_call_operand.vmem [shape: f32[1,32], index: 8, kind: input, shape index: {}]   ;;  %s1985_s9 = inlined_call_operand.vmem [shape: bf16[32,16], index: 9, kind: input, shape index: {}]   ;;  %s1986_s10 = inlined_call_operand.vmem [shape: f32[1,16], index: 10, kind: input, shape index: {}]   ;;  %s1987_s11 = inlined_call_operand.vmem [shape: f32[1,16], index: 11, kind: input, shape index: {}]   ;;  %s1988_s12 = inlined_call_operand.<no memory space> [shape: f32[1,1], index: 12, kind: input, shape index: {}]   ;;  %s1989_s13 = inlined_call_operand.hbm [shape: f32[1,128], index: 13, kind: output, shape index: {}]  }
   0x1   :  { %v18_v0 = vstv %s1988_s12 }
   0x2   :  { %19 = vst [vmem:[#allocation2] sm:$0x1] %v18_v0 }
   0x3   :  { %v1384_v1 = vld [vmem:[%s1978_s2 + $0x38] sm:$0xff]  ;;  %v1383_v2 = vld [vmem:[%s1978_s2 + $0x30] sm:$0xff]  ;;  %v615_v3 = vld [vmem:[%s1980_s4 + $0x8] sm:$0x3]  ;;  %vm694_vm0 = vcmask 1041408  }
   0x4   :  { %176 = vmatpush.bf16.msra.mxu0 %v1384_v1  ;;  %v665_v4 = vunpack.c.l.b16 %v615_v3 }
   0x5   :  { %20 = vsyncpa [#allocation4], 0  ;;  %v1382_v5 = vld [vmem:[%s1978_s2 + $0x28] sm:$0xff]  ;;  %v1381_v8 = vld [vmem:[%s1978_s2 + $0x20] sm:$0xff]  ;;  %vm669_vm1 = vcmask 162816   ;;  %s1444_s29 = smov 80  }
   0x6   :  { %v667_v6 = vpack.c.b16 %v665_v4, %v665_v4  ;;  %v1380_v9 = vld [vmem:[%s1978_s2 + $0x18] sm:$0xff]  ;;  %v1379_v10 = vld [vmem:[%s1978_s2 + $0x10] sm:$0xff]  ;;  %v1378_v11 = vld [vmem:[%s1978_s2 + $0x8] sm:$0xff]  ;;  %s1445_s30 = smov 96   ;;  %s1447_s16 = smov 48   ;;  %vm797_vm2 = vcmask 261120  }
   0x7   :  { %v1377_v12 = vld [vmem:[%s1978_s2] sm:$0xff]  ;;  %v1370_v14 = vld [vmem:[%s1976_s0 + $0x8] sm:$0xff]  ;;  %v1371_v15 = vld [vmem:[%s1976_s0 + $0x10] sm:$0xff]  ;;  %s1448_s12 = smov 64   ;;  %vm877_vm3 = vcmask 130048   ;;  %s1450_s17 = smov [#allocation3]  }
   0x8   :  { %177 = vmatpush.bf16.msra.mxu0 %v1383_v2  ;;  %v696_v7 = vsel %vm694_vm0, %v667_v6, 0  ;;  %v1369_v13 = vld [vmem:[%s1976_s0] sm:$0xff]  ;;  %v1372_v17 = vld [vmem:[%s1976_s0 + $0x18] sm:$0xff]  ;;  %v1374_v19 = vld [vmem:[%s1976_s0 + $0x28] sm:$0xff]  ;;  %s1189_s18 = sshll.u32 %s1450_s17, 4  ;;  %s1191_s21 = sshll.u32 %s1989_s13, 4  ;;  %s1190_s18 = int_to_ptr.vmem [resolvable:$true] %s1189_s18  ;;  %s1192_s21 = int_to_ptr.hbm [resolvable:$true] %s1191_s21 }
   0x9   :  { %1399 = vmatpush.bf16.msra.mxu1 %v696_v7  ;;  %1400 = vmatpush.bf16.msra.mxu2 %v696_v7  ;;  %v1393_v16 = vld [vmem:[%s1980_s4] sm:$0xff]  ;;  %v1375_v20 = vld [vmem:[%s1976_s0 + $0x30] sm:$0xff]  ;;  %v1376_v21 = vld [vmem:[%s1976_s0 + $0x38] sm:$0xff] }
   0xa   :  { %v1373_v18 = vld [vmem:[%s1976_s0 + $0x20] sm:$0xff]  ;;  %v1386_v22 = vld [vmem:[%s1977_s1 + $0x8] sm:$0xff]  ;;  %s1446_s0 = smov 112   ;;  %v1387_v25 = vld [vmem:[%s1977_s1 + $0x10] sm:$0xff] }
   0xb   :  { %v1385_v23 = vld [vmem:[%s1977_s1] sm:$0xff]  ;;  %v1388_v28 = vld [vmem:[%s1977_s1 + $0x18] sm:$0xff]  ;;  %v1390_v34 = vld [vmem:[%s1977_s1 + $0x28] sm:$0xff] }
   0xc   :  { %178 = vmatpush.bf16.msra.mxu0 %v1382_v5  ;;  %v1389_v31 = vld [vmem:[%s1977_s1 + $0x20] sm:$0xff]  ;;  %v1391_v37 = vld [vmem:[%s1977_s1 + $0x30] sm:$0xff]  ;;  %v1392_v39 = vld [vmem:[%s1977_s1 + $0x38] sm:$0xff] }
   0xd   :  { %1401 = vmatpush.bf16.msra.mxu1 %v1393_v16  ;;  %1402 = vmatpush.bf16.msra.mxu2 %v1393_v16  ;;  %v1394_v45 = vld [vmem:[%s1982_s6] sm:$0xff]  ;;  %v1396_v46 = vld [vmem:[%s1983_s7 + $0x8] sm:$0xff] }
   0xe   :  { %1404 = vmatpush.bf16.msra.mxu3 %v1394_v45  ;;  %v1395_v49 = vld [vmem:[%s1983_s7] sm:$0xff] }
   0xf   :  { %v1755_v63 = vld [vmem:[%s1981_s5] ss:$0 sm:$0xff] }
  0x10   :  { %179 = vmatpush.bf16.msra.mxu0 %v1381_v8  ;;  %1301 = vmatmul.msk.bf16.vlgmr.msra.gmra.mxu1 %vm669_vm1, %v1386_v22 }
  0x11   :  { %1307 = vmatmul.msk.bf16.vlgmr.msra.gmra.mxu2 %vm669_vm1, %v1392_v39  ;;  %909 = vmatpush.bf16.msrb.mxu1 %v1394_v45 }
  0x12   :  { %828 = vmatpush.bf16.msrb.mxu2 %v1396_v46 }
  0x14   :  { %180 = vmatpush.bf16.msra.mxu0 %v1380_v9 }
  0x16   :  { %829 = vmatpush.bf16.msrb.mxu2 %v1395_v49 }
  0x18   :  { %181 = vmatpush.bf16.msra.mxu0 %v1379_v10  ;;  %v1770_v10 = vld [vmem:[%s1979_s3] ss:$0 sm:$0xff] }
  0x1a   :  { %1403 = vmatpush.bf16.msra.mxu2 %v1394_v45 }
  0x1c   :  { %182 = vmatpush.bf16.msra.mxu0 %v1378_v11 }
  0x20   :  { %183 = vmatpush.bf16.msra.mxu0 %v1377_v12  ;;  %1302 = vmatmul.msk.bf16.gmra.mxu1 %vm669_vm1, %v1387_v25 }
  0x23   :  { %184 = vmatmul.bf16.vlgmr.msra.gmra.mxu0 %v1369_v13 }
  0x24   :  { %704 = vmatpush.bf16.msrb.mxu0 %v696_v7 }
  0x28   :  { %705 = vmatpush.bf16.msrb.mxu0 %v1393_v16 }
  0x30   :  { %1303 = vmatmul.msk.bf16.gmra.mxu1 %vm669_vm1, %v1388_v28 }
  0x33   :  { %189 = vmatmul.bf16.gmra.mxu0 %v1370_v14 }
  0x40   :  { %1304 = vmatmul.msk.bf16.gmra.mxu1 %vm669_vm1, %v1389_v31 }
  0x43   :  { %194 = vmatmul.bf16.gmra.mxu0 %v1371_v15 }
  0x50   :  { %1305 = vmatmul.msk.bf16.gmra.mxu1 %vm669_vm1, %v1390_v34 }
  0x53   :  { %199 = vmatmul.bf16.gmra.mxu0 %v1372_v17 }
  0x60   :  { %1306 = vmatmul.msk.bf16.gmra.mxu1 %vm669_vm1, %v1391_v37 }
  0x63   :  { %204 = vmatmul.bf16.gmra.mxu0 %v1373_v18 }
  0x73   :  { %209 = vmatmul.bf16.gmra.mxu0 %v1374_v19 }
  0x83   :  { %214 = vmatmul.bf16.gmra.mxu0 %v1375_v20 }
  0x8d   :  { %v712_v51 = vpop.f32.mrf.mxu1 }
  0x8e   :  { %v713_v31 = vadd.f32 %v1755_v63, %v712_v51 }
  0x93   :  { %219 = vmatmul.bf16.gmra.mxu0 %v1376_v21 }
  0x95   :  { %v714_v60 = vpop.f32.mrf.mxu1 }
  0x96   :  { %v715_v39 = vadd.f32 %v1755_v63, %v714_v60 }
  0x98   :  { %v750_v45 = vmax.f32 %v715_v39, 0.0 }
  0x9d   :  { %v717_v7 = vpop.f32.mrf.mxu1 }
  0xa0   :  { %v1585_v24 = vpop.f32.mrf.mxu0 }
  0xa1   :  { %369 = vrot.lane.b32.xlu2 %v1585_v24, %s1444_s29  ;;  %305 = vrot.lane.b32.xlu1 %v1585_v24, %s1445_s30 }
  0xa2   :  { %241 = vrot.lane.b32.xlu0 %v1585_v24, %s1446_s0 }
  0xa3   :  { %1300 = vmatmul.msk.bf16.vlgmr.msrb.gmra.mxu0 %vm669_vm1, %v1385_v23 }
  0xa8   :  { %v1598_v26 = vpop.f32.mrf.mxu0 }
  0xa9   :  { %497 = vrot.lane.b32.xlu2 %v1585_v24, %s1447_s16  ;;  %307 = vrot.lane.b32.xlu1 %v1598_v26, %s1445_s30 }
  0xaa   :  { %433 = vrot.lane.b32.xlu0 %v1585_v24, %s1448_s12 }
  0xb0   :  { %v1606_v27 = vpop.f32.mrf.mxu0 }
  0xb1   :  { %371 = vrot.lane.b32.xlu2 %v1598_v26, %s1444_s29  ;;  %435 = vrot.lane.b32.xlu1 %v1598_v26, %s1448_s12 }
  0xb2   :  { %243 = vrot.lane.b32.xlu0 %v1598_v26, %s1446_s0 }
  0xb8   :  { %v1618_v29 = vpop.f32.mrf.mxu0 }
  0xb9   :  { %373 = vrot.lane.b32.xlu2 %v1606_v27, %s1444_s29  ;;  %245 = vrot.lane.b32.xlu1 %v1606_v27, %s1446_s0 }
  0xba   :  { %499 = vrot.lane.b32.xlu0 %v1598_v26, %s1447_s16 }
  0xc0   :  { %v1626_v30 = vpop.f32.mrf.mxu0 }
  0xc1   :  { %437 = vrot.lane.b32.xlu1 %v1606_v27, %s1448_s12  ;;  %247 = vrot.lane.b32.xlu2 %v1618_v29, %s1446_s0 }
  0xc2   :  { %309 = vrot.lane.b32.xlu0 %v1606_v27, %s1445_s30 }
  0xc8   :  { %v1638_v32 = vpop.f32.mrf.mxu0 }
  0xc9   :  { %311 = vrot.lane.b32.xlu1 %v1618_v29, %s1445_s30  ;;  %439 = vrot.lane.b32.xlu2 %v1618_v29, %s1448_s12 }
  0xca   :  { %501 = vrot.lane.b32.xlu0 %v1606_v27, %s1447_s16 }
  0xd0   :  { %v1646_v33 = vpop.f32.mrf.mxu0 }
  0xd1   :  { %503 = vrot.lane.b32.xlu1 %v1618_v29, %s1447_s16  ;;  %249 = vrot.lane.b32.xlu2 %v1626_v30, %s1446_s0 }
  0xd2   :  { %375 = vrot.lane.b32.xlu0 %v1618_v29, %s1444_s29 }
  0xd8   :  { %v1658_v35 = vpop.f32.mrf.mxu0 }
  0xd9   :  { %313 = vrot.lane.b32.xlu1 %v1626_v30, %s1445_s30  ;;  %441 = vrot.lane.b32.xlu2 %v1626_v30, %s1448_s12 }
  0xda   :  { %377 = vrot.lane.b32.xlu0 %v1626_v30, %s1444_s29 }
  0xe0   :  { %v1666_v36 = vpop.f32.mrf.mxu0 }
  0xe1   :  { %505 = vrot.lane.b32.xlu1 %v1626_v30, %s1447_s16  ;;  %315 = vrot.lane.b32.xlu2 %v1638_v32, %s1445_s30 }
  0xe2   :  { %251 = vrot.lane.b32.xlu0 %v1638_v32, %s1446_s0 }
  0xe8   :  { %v1678_v38 = vpop.f32.mrf.mxu0 }
  0xe9   :  { %379 = vrot.lane.b32.xlu1 %v1638_v32, %s1444_s29  ;;  %507 = vrot.lane.b32.xlu2 %v1638_v32, %s1447_s16 }
  0xea   :  { %443 = vrot.lane.b32.xlu0 %v1638_v32, %s1448_s12 }
  0xf0   :  { %v1690_v40 = vpop.f32.mrf.mxu0 }
  0xf1   :  { %381 = vrot.lane.b32.xlu1 %v1646_v33, %s1444_s29  ;;  %317 = vrot.lane.b32.xlu2 %v1646_v33, %s1445_s30 }
  0xf2   :  { %253 = vrot.lane.b32.xlu0 %v1646_v33, %s1446_s0 }
  0xf8   :  { %v1698_v41 = vpop.f32.mrf.mxu0 }
  0xf9   :  { %509 = vrot.lane.b32.xlu2 %v1646_v33, %s1447_s16  ;;  %255 = vrot.lane.b32.xlu1 %v1658_v35, %s1446_s0 }
  0xfa   :  { %445 = vrot.lane.b32.xlu0 %v1646_v33, %s1448_s12 }
  0xfb   :  { %v370_v42 = vpop.permute.xlu2 %369 }
 0x100   :  { %v1706_v43 = vpop.f32.mrf.mxu0 }
 0x101   :  { %383 = vrot.lane.b32.xlu2 %v1658_v35, %s1444_s29  ;;  %447 = vrot.lane.b32.xlu1 %v1658_v35, %s1448_s12 }
 0x102   :  { %319 = vrot.lane.b32.xlu0 %v1658_v35, %s1445_s30 }
 0x103   :  { %v498_v44 = vpop.permute.xlu2 %497 }
 0x108   :  { %v1720_v47 = vpop.f32.mrf.mxu0 }
 0x109   :  { %385 = vrot.lane.b32.xlu2 %v1666_v36, %s1444_s29  ;;  %257 = vrot.lane.b32.xlu1 %v1666_v36, %s1446_s0 }
 0x10a   :  { %511 = vrot.lane.b32.xlu0 %v1658_v35, %s1447_s16 }
 0x10b   :  { %v372_v48 = vpop.permute.xlu2 %371 }
 0x110   :  { %v1731_v50 = vpop.f32.mrf.mxu0 }
 0x111   :  { %449 = vrot.lane.b32.xlu1 %v1666_v36, %s1448_s12  ;;  %259 = vrot.lane.b32.xlu2 %v1678_v38, %s1446_s0 }
 0x112   :  { %321 = vrot.lane.b32.xlu0 %v1666_v36, %s1445_s30 }
 0x113   :  { %v306_v52 = vpop.permute.xlu1 %305  ;;  %v1739_v53 = vpop.permute.xlu2 %373 }
 0x114   :  { %v242_v54 = vpop.permute.xlu0 %241 }
 0x115   :  { %v289_v56 = vmax.f32 %v1585_v24, %v242_v54  ;;  %v719_v24 = vpop.f32.mrf.mxu1 }
 0x117   :  { %v353_v61 = vmax.f32 %v289_v56, %v306_v52 }
 0x118   :  { %v1741_v55 = vpop.f32.mrf.mxu0 }
 0x119   :  { %323 = vrot.lane.b32.xlu1 %v1678_v38, %s1445_s30  ;;  %451 = vrot.lane.b32.xlu2 %v1678_v38, %s1448_s12  ;;  %v417_v0 = vmax.f32 %v353_v61, %v370_v42  ;;  %v718_v61 = vadd.f32 %v1755_v63, %v717_v7 }
 0x11a   :  { %513 = vrot.lane.b32.xlu0 %v1666_v36, %s1447_s16 }
 0x11b   :  { %v308_v57 = vpop.permute.xlu1 %307  ;;  %v1750_v58 = vpop.permute.xlu2 %247 }
 0x11c   :  { %v434_v59 = vpop.permute.xlu0 %433 }
 0x11d   :  { %v481_v4 = vmax.f32 %v417_v0, %v434_v59  ;;  %v720_v0 = vadd.f32 %v1755_v63, %v719_v24 }
 0x11f   :  { %v545_v11 = vmax.f32 %v481_v4, %v498_v44  ;;  %v749_v44 = vmax.f32 %v713_v31, 0.0  ;;  %v751_v4 = vmax.f32 %v718_v61, 0.0 }
 0x120   :  { %v707_v62 = vpop.f32.mrf.mxu0 }
 0x121   :  { %515 = vrot.lane.b32.xlu1 %v1678_v38, %s1447_s16  ;;  %261 = vrot.lane.b32.xlu2 %v1690_v40, %s1446_s0  ;;  %v708_v5 = vadd.f32 %v1755_v63, %v707_v62  ;;  %v565_v20 = vadd.f32 %v1770_v10, %v545_v11  ;;  %v774_v51 = vpack.c.bf16 %v750_v45, %v749_v44 }
 0x122   :  { %387 = vrot.lane.b32.xlu0 %v1678_v38, %s1444_s29 }
 0x123   :  { %v436_v1 = vpop.permute.xlu1 %435  ;;  %v1763_v2 = vpop.permute.xlu2 %439  ;;  %v747_v12 = vmax.f32 %v708_v5, 0.0  ;;  %v581_v25 = vmax.f32 %v565_v20, 0.0 }
 0x124   :  { %v244_v3 = vpop.permute.xlu0 %243 }
 0x125   :  { %v290_v6 = vmax.f32 %v1598_v26, %v244_v3 }
 0x127   :  { %v354_v8 = vmax.f32 %v290_v6, %v308_v57  ;;  %v752_v6 = vmax.f32 %v720_v0, 0.0 }
 0x128   :  { %v709_v9 = vpop.f32.mrf.mxu0 }
 0x129   :  { %v710_v13 = vadd.f32 %v1755_v63, %v709_v9  ;;  %325 = vrot.lane.b32.xlu1 %v1690_v40, %s1445_s30  ;;  %453 = vrot.lane.b32.xlu2 %v1690_v40, %s1448_s12  ;;  %v418_v14 = vmax.f32 %v354_v8, %v372_v48  ;;  %v722_v48 = vpop.f32.mrf.mxu1  ;;  %v775_v11 = vpack.c.bf16 %v752_v6, %v751_v4 }
 0x12a   :  { %389 = vrot.lane.b32.xlu0 %v1690_v40, %s1444_s29 }
 0x12b   :  { %v748_v15 = vmax.f32 %v710_v13, 0.0  ;;  %v482_v16 = vmax.f32 %v418_v14, %v436_v1  ;;  %v246_v17 = vpop.permute.xlu1 %245  ;;  %v1779_v18 = vpop.permute.xlu2 %249 }
 0x12c   :  { %v500_v19 = vpop.permute.xlu0 %499  ;;  %v291_v46 = vmax.f32 %v1606_v27, %v246_v17  ;;  %v292_v27 = vmax.f32 %v1618_v29, %v1750_v58 }
 0x12d   :  { %v773_v21 = vpack.c.bf16 %v748_v15, %v747_v12  ;;  %v546_v22 = vmax.f32 %v482_v16, %v500_v19  ;;  %v293_v19 = vmax.f32 %v1626_v30, %v1779_v18 }
 0x12f   :  { %v566_v23 = vadd.f32 %v1770_v10, %v546_v22  ;;  %1316 = vmatmul.msk.bf16.vlgmr.msrb.gmra.mxu2 %vm797_vm2, %v773_v21  ;;  %v723_v21 = vadd.f32 %v1755_v63, %v722_v48 }
 0x131   :  { %v582_v26 = vmax.f32 %v566_v23, 0.0  ;;  %517 = vrot.lane.b32.xlu1 %v1690_v40, %s1447_s16  ;;  %327 = vrot.lane.b32.xlu2 %v1698_v41, %s1445_s30  ;;  %v724_v3 = vpop.f32.mrf.mxu1 }
 0x132   :  { %263 = vrot.lane.b32.xlu0 %v1698_v41, %s1446_s0  ;;  %v725_v23 = vadd.f32 %v1755_v63, %v724_v3 }
 0x133   :  { %v763_v28 = vpack.c.bf16 %v582_v26, %v581_v25  ;;  %v438_v34 = vpop.permute.xlu1 %437  ;;  %v1791_v37 = vpop.permute.xlu2 %441  ;;  %v753_v26 = vmax.f32 %v723_v21, 0.0 }
 0x134   :  { %v310_v42 = vpop.permute.xlu0 %309 }
 0x135   :  { %1328 = vmatmul.msk.bf16.vlgmr.msrb.gmra.mxu1 %vm877_vm3, %v763_v28  ;;  %v355_v49 = vmax.f32 %v291_v46, %v310_v42  ;;  %v754_v28 = vmax.f32 %v725_v23, 0.0 }
 0x137   :  { %v419_v57 = vmax.f32 %v355_v49, %v1739_v53  ;;  %v776_v42 = vpack.c.bf16 %v754_v28, %v753_v26 }
 0x139   :  { %391 = vrot.lane.b32.xlu1 %v1698_v41, %s1444_s29  ;;  %519 = vrot.lane.b32.xlu2 %v1698_v41, %s1447_s16  ;;  %v483_v59 = vmax.f32 %v419_v57, %v438_v34  ;;  %v727_v16 = vpop.f32.mrf.mxu1 }
 0x13a   :  { %455 = vrot.lane.b32.xlu0 %v1698_v41, %s1448_s12 }
 0x13b   :  { %v312_v52 = vpop.permute.xlu1 %311  ;;  %v316_v54 = vpop.permute.xlu2 %315 }
 0x13c   :  { %v502_v56 = vpop.permute.xlu0 %501  ;;  %v356_v60 = vmax.f32 %v292_v27, %v312_v52 }
 0x13d   :  { %v547_v29 = vmax.f32 %v483_v59, %v502_v56  ;;  %v728_v56 = vadd.f32 %v1755_v63, %v727_v16 }
 0x13f   :  { %1317 = vmatmul.msk.bf16.gmra.mxu2 %vm797_vm2, %v774_v51  ;;  %v567_v8 = vadd.f32 %v1770_v10, %v547_v29 }
 0x141   :  { %393 = vrot.lane.b32.xlu1 %v1706_v43, %s1444_s29  ;;  %329 = vrot.lane.b32.xlu2 %v1706_v43, %s1445_s30  ;;  %v729_v31 = vpop.f32.mrf.mxu1 }
 0x142   :  { %265 = vrot.lane.b32.xlu0 %v1706_v43, %s1446_s0  ;;  %v730_v27 = vadd.f32 %v1755_v63, %v729_v31 }
 0x143   :  { %v504_v62 = vpop.permute.xlu1 %503  ;;  %v508_v53 = vpop.permute.xlu2 %507 }
 0x144   :  { %v376_v1 = vpop.permute.xlu0 %375  ;;  %v756_v0 = vmax.f32 %v730_v27, 0.0 }
 0x145   :  { %v420_v58 = vmax.f32 %v356_v60, %v376_v1 }
 0x147   :  { %v484_v5 = vmax.f32 %v420_v58, %v1763_v2  ;;  %v583_v2 = vmax.f32 %v567_v8, 0.0 }
 0x149   :  { %v548_v9 = vmax.f32 %v484_v5, %v504_v62  ;;  %521 = vrot.lane.b32.xlu2 %v1706_v43, %s1447_s16  ;;  %267 = vrot.lane.b32.xlu1 %v1720_v47, %s1446_s0 }
 0x14a   :  { %457 = vrot.lane.b32.xlu0 %v1706_v43, %s1448_s12 }
 0x14b   :  { %v568_v7 = vadd.f32 %v1770_v10, %v548_v9  ;;  %v314_v12 = vpop.permute.xlu1 %313  ;;  %v318_v13 = vpop.permute.xlu2 %317 }
 0x14c   :  { %v378_v14 = vpop.permute.xlu0 %377  ;;  %v357_v20 = vmax.f32 %v293_v19, %v314_v12 }
 0x14d   :  { %v584_v15 = vmax.f32 %v568_v7, 0.0 }
 0x14e   :  { %v421_v30 = vmax.f32 %v357_v20, %v378_v14 }
 0x14f   :  { %1318 = vmatmul.msk.bf16.gmra.mxu2 %vm797_vm2, %v775_v11  ;;  %v764_v17 = vpack.c.bf16 %v584_v15, %v583_v2 }
 0x150   :  { %v485_v34 = vmax.f32 %v421_v30, %v1791_v37 }
 0x151   :  { %1329 = vmatmul.msk.bf16.gmra.mxu1 %vm877_vm3, %v764_v17  ;;  %395 = vrot.lane.b32.xlu2 %v1720_v47, %s1444_s29 }
 0x152   :  { %331 = vrot.lane.b32.xlu0 %v1720_v47, %s1445_s30  ;;  %459 = vrot.lane.b32.xlu1 %v1720_v47, %s1448_s12 }
 0x153   :  { %v506_v22 = vpop.permute.xlu1 %505  ;;  %v1835_v25 = vpop.permute.xlu2 %509 }
 0x154   :  { %v252_v24 = vpop.permute.xlu0 %251  ;;  %v549_v45 = vmax.f32 %v485_v34, %v506_v22 }
 0x155   :  { %v294_v18 = vmax.f32 %v1638_v32, %v252_v24 }
 0x156   :  { %v569_v51 = vadd.f32 %v1770_v10, %v549_v45 }
 0x157   :  { %v358_v39 = vmax.f32 %v294_v18, %v316_v54  ;;  %v732_v54 = vpop.f32.mrf.mxu1 }
 0x158   :  { %v585_v59 = vmax.f32 %v569_v51, 0.0  ;;  %v733_v11 = vadd.f32 %v1755_v63, %v732_v54 }
 0x159   :  { %397 = vrot.lane.b32.xlu2 %v1731_v50, %s1444_s29 }
 0x15a   :  { %523 = vrot.lane.b32.xlu0 %v1720_v47, %s1447_s16  ;;  %269 = vrot.lane.b32.xlu1 %v1731_v50, %s1446_s0  ;;  %v757_v16 = vmax.f32 %v733_v11, 0.0 }
 0x15b   :  { %v380_v44 = vpop.permute.xlu1 %379  ;;  %v384_v49 = vpop.permute.xlu2 %383 }
 0x15c   :  { %v422_v46 = vmax.f32 %v358_v39, %v380_v44  ;;  %v444_v32 = vpop.permute.xlu0 %443 }
 0x15e   :  { %v486_v48 = vmax.f32 %v422_v46, %v444_v32  ;;  %v742_v46 = vpop.f32.mrf.mxu2 }
 0x15f   :  { %1319 = vmatmul.msk.bf16.gmra.mxu2 %vm797_vm2, %v776_v42  ;;  %v734_v5 = vpop.f32.mrf.mxu1 }
 0x160   :  { %v550_v52 = vmax.f32 %v486_v48, %v508_v53  ;;  %v755_v53 = vmax.f32 %v728_v56, 0.0  ;;  %v735_v12 = vadd.f32 %v1755_v63, %v734_v5 }
 0x161   :  { %271 = vrot.lane.b32.xlu2 %v1741_v55, %s1446_s0 }
 0x162   :  { %v570_v37 = vadd.f32 %v1770_v10, %v550_v52  ;;  %333 = vrot.lane.b32.xlu0 %v1731_v50, %s1445_s30  ;;  %461 = vrot.lane.b32.xlu1 %v1731_v50, %s1448_s12  ;;  %v777_v29 = vpack.c.bf16 %v756_v0, %v755_v53  ;;  %v758_v19 = vmax.f32 %v735_v12, 0.0 }
 0x163   :  { %v382_v57 = vpop.permute.xlu1 %381  ;;  %v1857_v1 = vpop.permute.xlu2 %385 }
 0x164   :  { %v586_v60 = vmax.f32 %v570_v37, 0.0  ;;  %v254_v61 = vpop.permute.xlu0 %253  ;;  %v778_v22 = vpack.c.bf16 %v758_v19, %v757_v16 }
 0x165   :  { %v295_v3 = vmax.f32 %v1646_v33, %v254_v61 }
 0x166   :  { %v765_v62 = vpack.c.bf16 %v586_v60, %v585_v59  ;;  %v744_v54 = vpop.f32.mrf.mxu2 }
 0x167   :  { %v359_v6 = vmax.f32 %v295_v3, %v318_v13  ;;  %v737_v15 = vpop.f32.mrf.mxu1  ;;  %v745_v59 = vadd.f32 %v1755_v63, %v744_v54 }
 0x168   :  { %1330 = vmatmul.msk.bf16.gmra.mxu1 %vm877_vm3, %v765_v62  ;;  %v738_v39 = vadd.f32 %v1755_v63, %v737_v15 }
 0x169   :  { %463 = vrot.lane.b32.xlu2 %v1741_v55, %s1448_s12  ;;  %v423_v8 = vmax.f32 %v359_v6, %v382_v57  ;;  %v743_v57 = vadd.f32 %v1755_v63, %v742_v46  ;;  %v762_v3 = vmax.f32 %v745_v59, 0.0 }
 0x16a   :  { %399 = vrot.lane.b32.xlu0 %v1741_v55, %s1444_s29  ;;  %335 = vrot.lane.b32.xlu1 %v1741_v55, %s1445_s30  ;;  %v759_v48 = vmax.f32 %v738_v39, 0.0 }
 0x16b   :  { %v256_v58 = vpop.permute.xlu1 %255  ;;  %v260_v7 = vpop.permute.xlu2 %259  ;;  %v761_v0 = vmax.f32 %v743_v57, 0.0 }
 0x16c   :  { %v446_v4 = vpop.permute.xlu0 %445  ;;  %v296_v9 = vmax.f32 %v1658_v35, %v256_v58  ;;  %v298_v61 = vmax.f32 %v1678_v38, %v260_v7 }
 0x16d   :  { %v487_v2 = vmax.f32 %v423_v8, %v446_v4  ;;  %v780_v5 = vpack.c.bf16 %v762_v3, %v761_v0 }
 0x16f   :  { %1320 = vmatmul.msk.bf16.gmra.mxu2 %vm797_vm2, %v777_v29  ;;  %v551_v20 = vmax.f32 %v487_v2, %v1835_v25  ;;  %v739_v28 = vpop.f32.mrf.mxu1 }
 0x170   :  { %v740_v25 = vadd.f32 %v1755_v63, %v739_v28 }
 0x171   :  { %v571_v35 = vadd.f32 %v1770_v10, %v551_v20 }
 0x172   :  { %525 = vrot.lane.b32.xlu0 %v1731_v50, %s1447_s16  ;;  %527 = vrot.lane.b32.xlu1 %v1741_v55, %s1447_s16 }
 0x173   :  { %v448_v33 = vpop.permute.xlu1 %447  ;;  %v452_v30 = vpop.permute.xlu2 %451  ;;  %v587_v31 = vmax.f32 %v571_v35, 0.0 }
 0x174   :  { %v320_v14 = vpop.permute.xlu0 %319 }
 0x175   :  { %v360_v13 = vmax.f32 %v296_v9, %v320_v14 }
 0x177   :  { %v424_v17 = vmax.f32 %v360_v13, %v384_v49  ;;  %v760_v49 = vmax.f32 %v740_v25, 0.0 }
 0x179   :  { %v488_v21 = vmax.f32 %v424_v17, %v448_v33  ;;  %v779_v51 = vpack.c.bf16 %v760_v49, %v759_v48 }
 0x17b   :  { %v258_v23 = vpop.permute.xlu1 %257  ;;  %v262_v32 = vpop.permute.xlu2 %261 }
 0x17c   :  { %v512_v24 = vpop.permute.xlu0 %511  ;;  %v297_v62 = vmax.f32 %v1666_v36, %v258_v23  ;;  %v299_v63 = vmax.f32 %v1690_v40, %v262_v32 }
 0x17d   :  { %v552_v18 = vmax.f32 %v488_v21, %v512_v24 }
 0x17f   :  { %v572_v26 = vadd.f32 %v1770_v10, %v552_v18  ;;  %1321 = vmatmul.msk.bf16.gmra.mxu2 %vm797_vm2, %v778_v22 }
 0x181   :  { %v588_v34 = vmax.f32 %v572_v26, 0.0 }
 0x183   :  { %v450_v42 = vpop.permute.xlu1 %449  ;;  %v766_v44 = vpack.c.bf16 %v588_v34, %v587_v31  ;;  %v454_v56 = vpop.permute.xlu2 %453 }
 0x184   :  { %v322_v45 = vpop.permute.xlu0 %321 }
 0x185   :  { %1331 = vmatmul.msk.bf16.gmra.mxu1 %vm877_vm3, %v766_v44  ;;  %v361_v29 = vmax.f32 %v297_v62, %v322_v45 }
 0x187   :  { %v425_v9 = vmax.f32 %v361_v29, %v1857_v1 }
 0x189   :  { %v489_v33 = vmax.f32 %v425_v9, %v450_v42 }
 0x18b   :  { %v324_v52 = vpop.permute.xlu1 %323  ;;  %v328_v4 = vpop.permute.xlu2 %327 }
 0x18c   :  { %v514_v37 = vpop.permute.xlu0 %513  ;;  %v362_v53 = vmax.f32 %v298_v61, %v324_v52  ;;  %v1398_v52 = vld [vmem:[%s1985_s9 + $0x8] sm:$0xff] }
 0x18d   :  { %v553_v36 = vmax.f32 %v489_v33, %v514_v37  ;;  %1045 = vmatpush.bf16.msrb.mxu3 %v1398_v52 }
 0x18f   :  { %1322 = vmatmul.msk.bf16.gmra.mxu2 %vm797_vm2, %v779_v51  ;;  %v573_v17 = vadd.f32 %v1770_v10, %v553_v36 }
 0x191   :  { %v589_v21 = vmax.f32 %v573_v17, 0.0 }
 0x193   :  { %v516_v27 = vpop.permute.xlu1 %515  ;;  %v520_v13 = vpop.permute.xlu2 %519 }
 0x194   :  { %v388_v60 = vpop.permute.xlu0 %387 }
 0x195   :  { %v426_v58 = vmax.f32 %v362_v53, %v388_v60 }
 0x197   :  { %v490_v11 = vmax.f32 %v426_v58, %v452_v30 }
 0x199   :  { %v554_v38 = vmax.f32 %v490_v11, %v516_v27 }
 0x19b   :  { %v326_v6 = vpop.permute.xlu1 %325  ;;  %v574_v2 = vadd.f32 %v1770_v10, %v554_v38  ;;  %v330_v18 = vpop.permute.xlu2 %329 }
 0x19c   :  { %v390_v8 = vpop.permute.xlu0 %389  ;;  %v363_v7 = vmax.f32 %v299_v63, %v326_v6 }
 0x19d   :  { %v590_v1 = vmax.f32 %v574_v2, 0.0 }
 0x19e   :  { %v427_v15 = vmax.f32 %v363_v7, %v390_v8 }
 0x19f   :  { %1323 = vmatmul.msk.bf16.gmra.mxu2 %vm797_vm2, %v780_v5  ;;  %v767_v35 = vpack.c.bf16 %v590_v1, %v589_v21 }
 0x1a0   :  { %v491_v19 = vmax.f32 %v427_v15, %v454_v56 }
 0x1a3   :  { %v518_v12 = vpop.permute.xlu1 %517  ;;  %v522_v45 = vpop.permute.xlu2 %521 }
 0x1a4   :  { %v264_v14 = vpop.permute.xlu0 %263  ;;  %v555_v40 = vmax.f32 %v491_v19, %v518_v12 }
 0x1a5   :  { %v300_v16 = vmax.f32 %v1698_v41, %v264_v14 }
 0x1a6   :  { %v575_v26 = vadd.f32 %v1770_v10, %v555_v40 }
 0x1a7   :  { %v364_v20 = vmax.f32 %v300_v16, %v328_v4 }
 0x1a8   :  { %v591_v39 = vmax.f32 %v575_v26, 0.0 }
 0x1ab   :  { %v392_v22 = vpop.permute.xlu1 %391  ;;  %v396_v54 = vpop.permute.xlu2 %395 }
 0x1ac   :  { %v428_v23 = vmax.f32 %v364_v20, %v392_v22  ;;  %v456_v24 = vpop.permute.xlu0 %455 }
 0x1ae   :  { %v492_v30 = vmax.f32 %v428_v23, %v456_v24 }
 0x1af   :  { %1332 = vmatmul.msk.bf16.vlgmr.msra.gmra.mxu2 %vm877_vm3, %v767_v35 }
 0x1b0   :  { %v556_v28 = vmax.f32 %v492_v30, %v520_v13 }
 0x1b2   :  { %v576_v41 = vadd.f32 %v1770_v10, %v556_v28  ;;  %v1895_v31 = vpop.f32.mrf.mxu2  ;;  %v911_v14 = vpop.f32.mrf.mxu1 }
 0x1b3   :  { %v394_v34 = vpop.permute.xlu1 %393  ;;  %v398_v5 = vpop.permute.xlu2 %397 }
 0x1b4   :  { %v592_v42 = vmax.f32 %v576_v41, 0.0  ;;  %v266_v44 = vpop.permute.xlu0 %265 }
 0x1b5   :  { %v301_v32 = vmax.f32 %v1706_v43, %v266_v44  ;;  %v912_v44 = vadd.f32 %v911_v14, %v1895_v31 }
 0x1b6   :  { %v768_v25 = vpack.c.bf16 %v592_v42, %v591_v39 }
 0x1b7   :  { %v365_v51 = vmax.f32 %v301_v32, %v330_v18 }
 0x1b8   :  { %1333 = vmatmul.msk.bf16.vlgmr.msra.gmra.mxu3 %vm877_vm3, %v768_v25  ;;  %v1920_v25 = vld [vmem:[%s1984_s8] ss:$0 sm:$0xff] }
 0x1b9   :  { %v429_v56 = vmax.f32 %v365_v51, %v394_v34 }
 0x1ba   :  { %v833_v46 = vpop.f32.mrf.mxu2  ;;  %v913_v18 = vpop.f32.mrf.mxu1 }
 0x1bb   :  { %v268_v48 = vpop.permute.xlu1 %267  ;;  %v272_v7 = vpop.permute.xlu2 %271  ;;  %v914_v42 = vadd.f32 %v913_v18, %v833_v46 }
 0x1bc   :  { %v458_v49 = vpop.permute.xlu0 %457  ;;  %v302_v57 = vmax.f32 %v1720_v47, %v268_v48  ;;  %v1397_v47 = vld [vmem:[%s1985_s9] sm:$0xff]  ;;  %v304_v2 = vmax.f32 %v1741_v55, %v272_v7 }
 0x1bd   :  { %v493_v60 = vmax.f32 %v429_v56, %v458_v49  ;;  %1046 = vmatpush.bf16.msrb.mxu3 %v1397_v47  ;;  %v956_v32 = vadd.f32 %v1920_v25, %v914_v42 }
 0x1bf   :  { %v557_v43 = vmax.f32 %v493_v60, %v522_v45  ;;  %v972_v48 = vmax.f32 %v956_v32, 0.0 }
 0x1c1   :  { %v577_v58 = vadd.f32 %v1770_v10, %v557_v43 }
 0x1c2   :  { %v1902_v37 = vpop.f32.mrf.mxu2 }
 0x1c3   :  { %v593_v8 = vmax.f32 %v577_v58, 0.0  ;;  %v464_v20 = vpop.permute.xlu2 %463 }
 0x1c4   :  { %v332_v27 = vpop.permute.xlu0 %331  ;;  %v460_v59 = vpop.permute.xlu1 %459 }
 0x1c5   :  { %v366_v61 = vmax.f32 %v302_v57, %v332_v27 }
 0x1c7   :  { %v430_v62 = vmax.f32 %v366_v61, %v396_v54 }
 0x1c9   :  { %v494_v0 = vmax.f32 %v430_v62, %v460_v59 }
 0x1ca   :  { %v838_v53 = vpop.f32.mrf.mxu2 }
 0x1cc   :  { %v524_v3 = vpop.permute.xlu0 %523  ;;  %v270_v29 = vpop.permute.xlu1 %269 }
 0x1cd   :  { %v558_v4 = vmax.f32 %v494_v0, %v524_v3  ;;  %v303_v36 = vmax.f32 %v1731_v50, %v270_v29 }
 0x1ce   :  { %v916_v39 = vpop.f32.mrf.mxu1 }
 0x1cf   :  { %v578_v6 = vadd.f32 %v1770_v10, %v558_v4  ;;  %v917_v31 = vadd.f32 %v916_v39, %v1902_v37 }
 0x1d1   :  { %v594_v9 = vmax.f32 %v578_v6, 0.0  ;;  %v957_v59 = vadd.f32 %v1920_v25, %v917_v31 }
 0x1d2   :  { %v841_v11 = vpop.f32.mrf.mxu2 }
 0x1d3   :  { %v769_v63 = vpack.c.bf16 %v594_v9, %v593_v8  ;;  %v973_v61 = vmax.f32 %v957_v59, 0.0 }
 0x1d4   :  { %v334_v33 = vpop.permute.xlu0 %333  ;;  %v462_v38 = vpop.permute.xlu1 %461 }
 0x1d5   :  { %1334 = vmatmul.msk.bf16.gmra.mxu3 %vm877_vm3, %v769_v63  ;;  %v367_v13 = vmax.f32 %v303_v36, %v334_v33 }
 0x1d6   :  { %v918_v49 = vpop.f32.mrf.mxu1 }
 0x1d7   :  { %v431_v1 = vmax.f32 %v367_v13, %v398_v5  ;;  %v919_v46 = vadd.f32 %v918_v49, %v838_v53 }
 0x1d9   :  { %v495_v22 = vmax.f32 %v431_v1, %v462_v38  ;;  %v958_v27 = vadd.f32 %v1920_v25, %v919_v46 }
 0x1da   :  { %v843_v12 = vpop.f32.mrf.mxu2 }
 0x1db   :  { %v974_v60 = vmax.f32 %v958_v27, 0.0 }
 0x1dc   :  { %v400_v15 = vpop.permute.xlu0 %399  ;;  %v336_v16 = vpop.permute.xlu1 %335 }
 0x1dd   :  { %v368_v17 = vmax.f32 %v304_v2, %v336_v16  ;;  %v988_v0 = vpack.c.bf16 %v974_v60, %v973_v61 }
 0x1df   :  { %v432_v19 = vmax.f32 %v368_v17, %v400_v15 }
 0x1e1   :  { %v496_v40 = vmax.f32 %v432_v19, %v464_v20 }
 0x1e2   :  { %v846_v21 = vpop.f32.mrf.mxu2 }
 0x1e4   :  { %v526_v23 = vpop.permute.xlu0 %525  ;;  %v528_v24 = vpop.permute.xlu1 %527 }
 0x1e5   :  { %v559_v35 = vmax.f32 %v495_v22, %v526_v23  ;;  %v560_v30 = vmax.f32 %v496_v40, %v528_v24  ;;  %v921_v56 = vpop.f32.mrf.mxu1 }
 0x1e6   :  { %v922_v29 = vadd.f32 %v921_v56, %v841_v11 }
 0x1e7   :  { %v579_v50 = vadd.f32 %v1770_v10, %v559_v35  ;;  %v580_v26 = vadd.f32 %v1770_v10, %v560_v30  ;;  %v955_v10 = vadd.f32 %v1920_v25, %v912_v44 }
 0x1e8   :  { %v959_v37 = vadd.f32 %v1920_v25, %v922_v29 }
 0x1e9   :  { %v595_v55 = vmax.f32 %v579_v50, 0.0  ;;  %v596_v28 = vmax.f32 %v580_v26, 0.0  ;;  %v971_v51 = vmax.f32 %v955_v10, 0.0 }
 0x1ea   :  { %v848_v41 = vpop.f32.mrf.mxu2  ;;  %v975_v6 = vmax.f32 %v959_v37, 0.0 }
 0x1eb   :  { %v770_v34 = vpack.c.bf16 %v596_v28, %v595_v55  ;;  %v987_v54 = vpack.c.bf16 %v972_v48, %v971_v51 }
 0x1ed   :  { %1335 = vmatmul.msk.bf16.gmra.mxu3 %vm877_vm3, %v770_v34  ;;  %v923_v62 = vpop.f32.mrf.mxu1 }
 0x1ee   :  { %v924_v3 = vadd.f32 %v923_v62, %v843_v12 }
 0x1f0   :  { %v960_v53 = vadd.f32 %v1920_v25, %v924_v3 }
 0x1f2   :  { %v851_v45 = vpop.f32.mrf.mxu2  ;;  %v976_v5 = vmax.f32 %v960_v53, 0.0 }
 0x1f4   :  { %v989_v9 = vpack.c.bf16 %v976_v5, %v975_v6  ;;  %v1417_v6 = vld [vmem:[%s1986_s10] ss:$0 sm:$0xff] }
 0x1fa   :  { %v853_v52 = vpop.f32.mrf.mxu2 }
 0x1fd   :  { %1344 = vmatmul.msk.bf16.vlgmr.msrb.gmra.mxu3 %vm797_vm2, %v987_v54 }
 0x202   :  { %v856_v57 = vpop.f32.mrf.mxu2  ;;  %v926_v58 = vpop.f32.mrf.mxu1 }
 0x203   :  { %v927_v33 = vadd.f32 %v926_v58, %v846_v21 }
 0x205   :  { %v961_v11 = vadd.f32 %v1920_v25, %v927_v33 }
 0x207   :  { %v977_v12 = vmax.f32 %v961_v11, 0.0 }
 0x20a   :  { %v858_v43 = vpop.f32.mrf.mxu2  ;;  %v928_v47 = vpop.f32.mrf.mxu1 }
 0x20b   :  { %v929_v63 = vadd.f32 %v928_v47, %v848_v41 }
 0x20d   :  { %1345 = vmatmul.msk.bf16.gmra.mxu3 %vm797_vm2, %v988_v0  ;;  %v962_v7 = vadd.f32 %v1920_v25, %v929_v63 }
 0x20f   :  { %v978_v36 = vmax.f32 %v962_v7, 0.0 }
 0x211   :  { %v990_v2 = vpack.c.bf16 %v978_v36, %v977_v12 }
 0x212   :  { %v861_v4 = vpop.f32.mrf.mxu2 }
 0x21a   :  { %v863_v8 = vpop.f32.mrf.mxu2 }
 0x21d   :  { %1346 = vmatmul.msk.bf16.gmra.mxu3 %vm797_vm2, %v989_v9 }
 0x222   :  { %v866_v38 = vpop.f32.mrf.mxu2 }
 0x22a   :  { %v868_v14 = vpop.f32.mrf.mxu2 }
 0x22d   :  { %1347 = vmatmul.msk.bf16.gmra.mxu3 %vm797_vm2, %v990_v2 }
 0x232   :  { %v931_v13 = vpop.f32.mrf.mxu2 }
 0x233   :  { %v932_v15 = vadd.f32 %v931_v13, %v851_v45 }
 0x235   :  { %v963_v17 = vadd.f32 %v1920_v25, %v932_v15 }
 0x237   :  { %v979_v21 = vmax.f32 %v963_v17, 0.0 }
 0x23a   :  { %v933_v16 = vpop.f32.mrf.mxu2 }
 0x23b   :  { %v934_v1 = vadd.f32 %v933_v16, %v853_v52  ;;  %v936_v19 = vpop.f32.mrf.mxu3 }
 0x23c   :  { %v937_v40 = vadd.f32 %v936_v19, %v856_v57 }
 0x23d   :  { %v964_v20 = vadd.f32 %v1920_v25, %v934_v1 }
 0x23e   :  { %v965_v35 = vadd.f32 %v1920_v25, %v937_v40  ;;  %v1449_v40 = vmov 0  }
 0x23f   :  { %v980_v22 = vmax.f32 %v964_v20, 0.0  ;;  %1412 = vset.pattern.permute.xlu2 %v1449_v40  ;;  %1413 = vset.pattern.permute.xlu0 %v1449_v40 }
 0x240   :  { %v981_v50 = vmax.f32 %v965_v35, 0.0 }
 0x241   :  { %v991_v23 = vpack.c.bf16 %v980_v22, %v979_v21  ;;  %v1105_v22 = vld [vmem:[#allocation2] sm:$0x1] }
 0x242   :  { %1108 = vperm.xlu2 %1412, %v1105_v22  }
 0x243   :  { %v938_v24 = vpop.f32.mrf.mxu3  ;;  %1348 = vmatmul.msk.bf16.gmra.mxu3 %vm797_vm2, %v991_v23 }
 0x244   :  { %v939_v30 = vadd.f32 %v938_v24, %v858_v43 }
 0x246   :  { %v966_v18 = vadd.f32 %v1920_v25, %v939_v30 }
 0x248   :  { %v982_v26 = vmax.f32 %v966_v18, 0.0 }
 0x24a   :  { %v992_v55 = vpack.c.bf16 %v982_v26, %v981_v50 }
 0x253   :  { %1349 = vmatmul.msk.bf16.gmra.mxu3 %vm797_vm2, %v992_v55 }
 0x258   :  { %v941_v28 = vpop.f32.mrf.mxu3 }
 0x259   :  { %v942_v41 = vadd.f32 %v941_v28, %v861_v4 }
 0x25b   :  { %v967_v39 = vadd.f32 %v1920_v25, %v942_v41 }
 0x25d   :  { %v983_v45 = vmax.f32 %v967_v39, 0.0 }
 0x260   :  { %v943_v34 = vpop.f32.mrf.mxu3 }
 0x261   :  { %v944_v42 = vadd.f32 %v943_v34, %v863_v8 }
 0x263   :  { %v968_v44 = vadd.f32 %v1920_v25, %v944_v42 }
 0x265   :  { %v984_v32 = vmax.f32 %v968_v44, 0.0  ;;  %v1104_v44 = vld [vmem:[%s1987_s11] sm:$0x1] }
 0x267   :  { %v993_v10 = vpack.c.bf16 %v984_v32, %v983_v45 }
 0x269   :  { %1350 = vmatmul.msk.bf16.gmra.mxu3 %vm797_vm2, %v993_v10 }
 0x270   :  { %v946_v48 = vpop.f32.mrf.mxu3 }
 0x271   :  { %v947_v49 = vadd.f32 %v946_v48, %v866_v38 }
 0x273   :  { %v969_v52 = vadd.f32 %v1920_v25, %v947_v49 }
 0x275   :  { %v985_v56 = vmax.f32 %v969_v52, 0.0 }
 0x278   :  { %v948_v51 = vpop.f32.mrf.mxu3 }
 0x279   :  { %v949_v54 = vadd.f32 %v948_v51, %v868_v14 }
 0x27b   :  { %v970_v46 = vadd.f32 %v1920_v25, %v949_v54 }
 0x27d   :  { %v986_v31 = vmax.f32 %v970_v46, 0.0 }
 0x27f   :  { %v994_v57 = vpack.c.bf16 %v986_v31, %v985_v56 }
 0x280   :  { %v1946_v27 = vpop.f32.mrf.mxu3 }
 0x281   :  { %1351 = vmatmul.msk.bf16.gmra.mxu3 %vm797_vm2, %v994_v57  ;;  %v1049_v34 = vadd.f32 %v1417_v6, %v1946_v27 }
 0x283   :  { %v1088_v42 = vmax.f32 %v1049_v34, 0.0 }
 0x288   :  { %v1050_v59 = vpop.f32.mrf.mxu3 }
 0x289   :  { %v1051_v28 = vadd.f32 %v1417_v6, %v1050_v59 }
 0x28b   :  { %v1089_v39 = vmax.f32 %v1051_v28, 0.0 }
 0x290   :  { %v1053_v60 = vpop.f32.mrf.mxu3 }
 0x291   :  { %v1054_v26 = vadd.f32 %v1417_v6, %v1053_v60 }
 0x293   :  { %v1090_v41 = vmax.f32 %v1054_v26, 0.0 }
 0x298   :  { %v1055_v61 = vpop.f32.mrf.mxu3 }
 0x299   :  { %v1056_v18 = vadd.f32 %v1417_v6, %v1055_v61 }
 0x29b   :  { %v1091_v55 = vmax.f32 %v1056_v18, 0.0 }
 0x29c   :  { %v1109_v45 = vpop.permute.xlu2 %1108 }
 0x29d   :  { %v1111_v32 = vperm.slane %v1109_v45, 0 }
 0x2a0   :  { %v1058_v62 = vpop.f32.mrf.mxu3 }
 0x2a1   :  { %v1059_v35 = vadd.f32 %v1417_v6, %v1058_v62 }
 0x2a3   :  { %v1092_v50 = vmax.f32 %v1059_v35, 0.0 }
 0x2a8   :  { %v1060_v43 = vpop.f32.mrf.mxu3 }
 0x2a9   :  { %v1061_v23 = vadd.f32 %v1417_v6, %v1060_v43 }
 0x2ab   :  { %v1093_v30 = vmax.f32 %v1061_v23, 0.0 }
 0x2b0   :  { %v1063_v0 = vpop.f32.mrf.mxu3 }
 0x2b1   :  { %v1064_v20 = vadd.f32 %v1417_v6, %v1063_v0 }
 0x2b3   :  { %v1094_v24 = vmax.f32 %v1064_v20, 0.0 }
 0x2b8   :  { %v1065_v3 = vpop.f32.mrf.mxu3 }
 0x2b9   :  { %v1066_v1 = vadd.f32 %v1417_v6, %v1065_v3 }
 0x2bb   :  { %v1095_v21 = vmax.f32 %v1066_v1, 0.0 }
 0x2c6   :  { %v1068_v29 = vpop.f32.mrf.mxu3 }
 0x2c7   :  { %v1069_v16 = vadd.f32 %v1417_v6, %v1068_v29 }
 0x2c9   :  { %v1096_v19 = vmax.f32 %v1069_v16, 0.0 }
 0x2ce   :  { %v1070_v58 = vpop.f32.mrf.mxu3 }
 0x2cf   :  { %v1071_v13 = vadd.f32 %v1417_v6, %v1070_v58 }
 0x2d1   :  { %v1097_v17 = vmax.f32 %v1071_v13, 0.0 }
 0x2d6   :  { %v1073_v4 = vpop.f32.mrf.mxu3 }
 0x2d7   :  { %v1074_v14 = vadd.f32 %v1417_v6, %v1073_v4 }
 0x2d9   :  { %v1098_v15 = vmax.f32 %v1074_v14, 0.0 }
 0x2de   :  { %v1075_v53 = vpop.f32.mrf.mxu3 }
 0x2df   :  { %v1076_v36 = vadd.f32 %v1417_v6, %v1075_v53 }
 0x2e1   :  { %v1099_v2 = vmax.f32 %v1076_v36, 0.0 }
 0x2ec   :  { %v1078_v37 = vpop.f32.mrf.mxu3 }
 0x2ed   :  { %v1079_v7 = vadd.f32 %v1417_v6, %v1078_v37 }
 0x2ef   :  { %v1100_v12 = vmax.f32 %v1079_v7, 0.0 }
 0x2f4   :  { %v1080_v25 = vpop.f32.mrf.mxu3 }
 0x2f5   :  { %v1081_v33 = vadd.f32 %v1417_v6, %v1080_v25 }
 0x2f7   :  { %v1101_v11 = vmax.f32 %v1081_v33, 0.0 }
 0x304   :  { %v1083_v5 = vpop.f32.mrf.mxu3 }
 0x305   :  { %v1084_v47 = vadd.f32 %v1417_v6, %v1083_v5 }
 0x307   :  { %v1102_v38 = vmax.f32 %v1084_v47, 0.0 }
 0x30c   :  { %v1085_v8 = vpop.f32.mrf.mxu3 }
 0x30d   :  { %v1086_v9 = vadd.f32 %v1417_v6, %v1085_v8 }
 0x30f   :  { %v1103_v63 = vmax.f32 %v1086_v9, 0.0 }
 0x311   :  { %1352 = vmatpush.xpose.msk.msra.mxu1 %vm877_vm3, %v1103_v63 }
 0x315   :  { %1353 = vmatpush.xpose.msk.msra.mxu1 %vm877_vm3, %v1102_v38 }
 0x319   :  { %1354 = vmatpush.xpose.msk.msra.mxu1 %vm877_vm3, %v1101_v11 }
 0x31d   :  { %1355 = vmatpush.xpose.msk.msra.mxu1 %vm877_vm3, %v1100_v12 }
 0x321   :  { %1356 = vmatpush.xpose.msk.msra.mxu1 %vm877_vm3, %v1099_v2 }
 0x325   :  { %1357 = vmatpush.xpose.msk.msra.mxu1 %vm877_vm3, %v1098_v15 }
 0x329   :  { %1358 = vmatpush.xpose.msk.msra.mxu1 %vm877_vm3, %v1097_v17 }
 0x32d   :  { %1359 = vmatpush.xpose.msk.msra.mxu1 %vm877_vm3, %v1096_v19 }
 0x331   :  { %1360 = vmatpush.xpose.msk.msra.mxu1 %vm877_vm3, %v1095_v21 }
 0x335   :  { %1361 = vmatpush.xpose.msk.msra.mxu1 %vm877_vm3, %v1094_v24 }
 0x339   :  { %1362 = vmatpush.xpose.msk.msra.mxu1 %vm877_vm3, %v1093_v30 }
 0x33d   :  { %1363 = vmatpush.xpose.msk.msra.mxu1 %vm877_vm3, %v1092_v50 }
 0x341   :  { %1364 = vmatpush.xpose.msk.msra.mxu1 %vm877_vm3, %v1091_v55 }
 0x345   :  { %1365 = vmatpush.xpose.msk.msra.mxu1 %vm877_vm3, %v1090_v41 }
 0x349   :  { %1366 = vmatpush.xpose.msk.msra.mxu1 %vm877_vm3, %v1089_v39 }
 0x34d   :  { %1367 = vmatpush.xpose.msk.msra.mxu1 %vm877_vm3, %v1088_v42 }
 0x350   :  { %1368 = vmatmul.msk.f32.vlgmr.msra.gmra.mxu1 %vm877_vm3, %v1104_v44 }
 0x3cd   :  { %v1180_v10 = vpop.f32.mrf.mxu1 }
 0x3ce   :  { %v1181_v48 = vadd.f32 %v1180_v10, %v1111_v32 }
 0x3d0   :  { %1183 = vst [vmem:[#allocation3] sm:$0x1] %v1181_v48 }
 0x3d1   :  { %1194 = dma.vmem_to_hbm [thread:$0]  %s1190_s18, 16, %s1192_s21, [#allocation4]  }
 0x3d2   :  { %1442 = dma.done.wait [#allocation4], 16  }
 0x3d3   :  { %1443 = vsyncadd [#allocation4], 4294967280 }
 0x3d4   :  { %1199 = vsyncpa [#allocation4], 1 }

</bundles_post_ra>
